<compile_context>
chip_gen: v7x
topology: tpu7x:2x2x1
jax: 0.10.0
libtpu: 0.0.40
codegen_flags: <defaults>
</compile_context>

<pallas_src>
import functools

import jax
import jax.numpy as jnp
from jax.experimental import pallas as pl
from jax.experimental.pallas import tpu as pltpu


def mlp_kernel(x_ref, w1t_ref, b1_ref, w2_ref, b2_ref, w3_ref, b3_ref,
               w4_ref, b4_ref, o_ref):
    cdt = w1t_ref.dtype                                   # bf16 MXU-input dtype

    # Layer 1, batch-major on the MXU: (TB, F) @ (F, 128) -> (TB, 128) f32.
    x = x_ref[...].astype(cdt)
    h = jnp.dot(x, w1t_ref[...], preferred_element_type=jnp.float32)
    h = jnp.maximum(h + b1_ref[...], 0.0)                 # bias (1, 128); f32 math
    # dropout(p=0.2) -> identity at inference

    # Single relayout to feature-major (batch on the 128-wide lane axis): every
    # remaining intermediate and the (1, TB) output tile are lane-dense.
    h = jnp.transpose(h)                                  # (128, TB) f32, XLU

    # Layer 2 + ReLU   (W2: (64, 128))
    h = jnp.dot(w2_ref[...], h.astype(cdt),
                preferred_element_type=jnp.float32) + b2_ref[...]
    h = jnp.maximum(h, 0.0)
    # dropout(p=0.2) -> identity at inference

    # Layer 3 + ReLU   (W3: (16, 64))
    h = jnp.dot(w3_ref[...], h.astype(cdt),
                preferred_element_type=jnp.float32) + b3_ref[...]
    h = jnp.maximum(h, 0.0)                               # (16, TB) f32

    # Layer 4 (16 -> 1): VPU multiply + sublane reduce instead of an N=1 MXU pass.
    w4 = w4_ref[...].astype(jnp.float32)                  # (16, 1), broadcast over lanes
    out = jnp.sum(h * w4, axis=0, keepdims=True)          # (1, TB)
    out = out + b4_ref[...].astype(jnp.float32)           # (1, 1) broadcast
    o_ref[...] = out.astype(o_ref.dtype)


def _round_up(n, m):
    return ((n + m - 1) // m) * m


@functools.partial(jax.jit, static_argnames=("max_tile_b", "compute_dtype"))
def g_factor_predictor(x, params, *, max_tile_b=2048, compute_dtype=jnp.bfloat16):
    """x: (B, input_size) float32.  params: PyTorch-layout weights (out, in), biases (out, 1)."""
    B, F = x.shape

    # Tile selection: big enough to amortize per-grid-step pipeline overhead, but keep
    # >=2 grid steps when B allows so "parallel" shards across v7x's two TensorCores.
    tile_b = min(max(128, _round_up(pl.cdiv(B, 2), 128)), max_tile_b)
    n_tiles = pl.cdiv(B, tile_b)

    w1t = params["w1"].T.astype(compute_dtype)                 # (F, 128), for x @ W1^T
    b1r = params["b1"].reshape(1, -1).astype(jnp.float32)      # (1, 128)
    w2 = params["w2"].astype(compute_dtype)                    # (64, 128)
    b2 = params["b2"].astype(jnp.float32)                      # (64, 1)
    w3 = params["w3"].astype(compute_dtype)                    # (16, 64)
    b3 = params["b3"].astype(jnp.float32)                      # (16, 1)
    w4_col = params["w4"].T.astype(compute_dtype)              # (16, 1)
    b4 = params["b4"].astype(jnp.float32)                      # (1, 1)
    # NOTE: folding b1 into W1 via a ones-column (and bf16 output) is a low single-digit
    # % win per the review; skipped to keep the wrapper free of extra passes over x.

    const = lambda i: (0, 0)                     # weights/biases resident in VMEM
    out = pl.pallas_call(
        mlp_kernel,
        out_shape=jax.ShapeDtypeStruct((1, B), jnp.float32),
        grid=(n_tiles,),
        in_specs=[
            pl.BlockSpec((tile_b, F), lambda i: (i, 0)),        # batch-major x tile
            pl.BlockSpec(w1t.shape, const),
            pl.BlockSpec(b1r.shape, const),
            pl.BlockSpec(w2.shape, const),
            pl.BlockSpec(b2.shape, const),
            pl.BlockSpec(w3.shape, const),
            pl.BlockSpec(b3.shape, const),
            pl.BlockSpec(w4_col.shape, const),
            pl.BlockSpec(b4.shape, const),
        ],
        out_specs=pl.BlockSpec((1, tile_b), lambda i: (0, i)),  # lane-dense output
        compiler_params=pltpu.CompilerParams(
            dimension_semantics=("parallel",),
            vmem_limit_bytes=32 * 1024 * 1024,
        ),
    )(x, w1t, b1r, w2, b2, w3, b3, w4_col, b4)

    return out.reshape(B, 1)


def init_params(key, input_size=9):
    """PyTorch nn.Linear-style uniform init; weights stored (out, in), biases (out, 1)."""
    def linear(k, fan_in, fan_out):
        kw, kb = jax.random.split(k)
        bound = 1.0 / jnp.sqrt(fan_in)
        w = jax.random.uniform(kw, (fan_out, fan_in), jnp.float32, -bound, bound)
        b = jax.random.uniform(kb, (fan_out, 1), jnp.float32, -bound, bound)
        return w, b

    k1, k2, k3, k4 = jax.random.split(key, 4)
    w1, b1 = linear(k1, input_size, 128)
    w2, b2 = linear(k2, 128, 64)
    w3, b3 = linear(k3, 64, 16)
    w4, b4 = linear(k4, 16, 1)
    return dict(w1=w1, b1=b1, w2=w2, b2=b2, w3=w3, b3=b3, w4=w4, b4=b4)


def reference_forward(x, p, dtype=jnp.float32):
    """Plain-JAX reference; `dtype` controls matmul input precision (f32 accumulate)."""
    def lin(h, w, b):
        y = jnp.dot(h.astype(dtype), w.T.astype(dtype),
                    preferred_element_type=jnp.float32)
        return y + b.reshape(1, -1)

    h = jnp.maximum(lin(x, p["w1"], p["b1"]), 0.0)
    h = jnp.maximum(lin(h, p["w2"], p["b2"]), 0.0)
    h = jnp.maximum(lin(h, p["w3"], p["b3"]), 0.0)
    return lin(h, p["w4"], p["b4"])


if __name__ == "__main__":
    key = jax.random.PRNGKey(0)
    kx, kp = jax.random.split(key)

    B, INPUT_SIZE = 300, 9          # not a multiple of 128 on purpose -> 2 ragged tiles
    x = jax.random.normal(kx, (B, INPUT_SIZE), jnp.float32)
    params = init_params(kp, INPUT_SIZE)

    out = g_factor_predictor(x, params)
    out = jax.block_until_ready(out)
    assert out.shape == (B, 1), out.shape

    # Match against a reference computed at the same (bf16-in, f32-acc) precision,
    # and sanity-check against the full-f32 reference with a bf16-scale tolerance.
    ref_bf16 = reference_forward(x, params, dtype=jnp.bfloat16)
    ref_f32 = reference_forward(x, params, dtype=jnp.float32)
    assert jnp.allclose(out, ref_bf16, atol=2e-3, rtol=2e-3), "mismatch vs bf16 reference"
    assert jnp.allclose(out, ref_f32, atol=5e-2, rtol=5e-2), "mismatch vs f32 reference"

    print("KERNEL_OK")
</pallas_src>

<mosaic_0001>
module attributes {stable_mosaic.version = 11 : i64} {
  func.func @mlp_kernel(%arg0: i32, %arg1: memref<256x9xf32, #tpu.memory_space<vmem>>, %arg2: memref<9x128xbf16, #tpu.memory_space<vmem>>, %arg3: memref<1x128xf32, #tpu.memory_space<vmem>>, %arg4: memref<64x128xbf16, #tpu.memory_space<vmem>>, %arg5: memref<64x1xf32, #tpu.memory_space<vmem>>, %arg6: memref<16x64xbf16, #tpu.memory_space<vmem>>, %arg7: memref<16x1xf32, #tpu.memory_space<vmem>>, %arg8: memref<16x1xbf16, #tpu.memory_space<vmem>>, %arg9: memref<1x1xf32, #tpu.memory_space<vmem>>, %arg10: memref<1x256xf32, #tpu.memory_space<vmem>>) attributes {dimension_semantics = [#tpu.dimension_semantics<parallel>], iteration_bounds = array<i64: 2>, scalar_prefetch = 0 : i64, scratch_operands = 0 : i64, tpu.core_type = #tpu.core_type<tc>, window_params = [{transform_indices = @transform_0, window_bounds = array<i64: 256, 9>}, {pipeline_mode = #tpu.pipeline_mode<synchronous>, transform_indices = @transform_1, window_bounds = array<i64: 9, 128>}, {pipeline_mode = #tpu.pipeline_mode<synchronous>, transform_indices = @transform_2, window_bounds = array<i64: 1, 128>}, {pipeline_mode = #tpu.pipeline_mode<synchronous>, transform_indices = @transform_3, window_bounds = array<i64: 64, 128>}, {pipeline_mode = #tpu.pipeline_mode<synchronous>, transform_indices = @transform_4, window_bounds = array<i64: 64, 1>}, {pipeline_mode = #tpu.pipeline_mode<synchronous>, transform_indices = @transform_5, window_bounds = array<i64: 16, 64>}, {pipeline_mode = #tpu.pipeline_mode<synchronous>, transform_indices = @transform_6, window_bounds = array<i64: 16, 1>}, {pipeline_mode = #tpu.pipeline_mode<synchronous>, transform_indices = @transform_7, window_bounds = array<i64: 16, 1>}, {pipeline_mode = #tpu.pipeline_mode<synchronous>, transform_indices = @transform_8, window_bounds = array<i64: 1, 1>}, {transform_indices = @transform_9, window_bounds = array<i64: 1, 256>}]} {
    %c0 = arith.constant 0 : index
    %c0_0 = arith.constant 0 : index
    %0 = vector.load %arg1[%c0, %c0_0] : memref<256x9xf32, #tpu.memory_space<vmem>>, vector<256x9xf32>
    %1 = arith.truncf %0 : vector<256x9xf32> to vector<256x9xbf16>
    %c0_1 = arith.constant 0 : index
    %c0_2 = arith.constant 0 : index
    %2 = vector.load %arg2[%c0_1, %c0_2] : memref<9x128xbf16, #tpu.memory_space<vmem>>, vector<9x128xbf16>
    %cst = arith.constant dense<0.000000e+00> : vector<256x128xf32>
    %3 = tpu.matmul %1, %2, %cst {dimension_numbers = #tpu.dot_dimension_numbers<[1], [0], [0], [1], [0, 0, 1, 1], [], []>} : vector<256x9xbf16>, vector<9x128xbf16>, vector<256x128xf32> -> vector<256x128xf32>
    %c0_3 = arith.constant 0 : index
    %c0_4 = arith.constant 0 : index
    %4 = vector.load %arg3[%c0_3, %c0_4] : memref<1x128xf32, #tpu.memory_space<vmem>>, vector<1x128xf32>
    %5 = vector.broadcast %4 : vector<1x128xf32> to vector<256x128xf32>
    %6 = arith.addf %3, %5 : vector<256x128xf32>
    %cst_5 = arith.constant 0.000000e+00 : f32
    %7 = vector.broadcast %cst_5 : f32 to vector<256x128xf32>
    %8 = arith.maximumf %6, %7 : vector<256x128xf32>
    %9 = tpu.transpose %8, [1, 0] : vector<256x128xf32> -> vector<128x256xf32>
    %c0_6 = arith.constant 0 : index
    %c0_7 = arith.constant 0 : index
    %10 = vector.load %arg4[%c0_6, %c0_7] : memref<64x128xbf16, #tpu.memory_space<vmem>>, vector<64x128xbf16>
    %11 = arith.truncf %9 : vector<128x256xf32> to vector<128x256xbf16>
    %cst_8 = arith.constant dense<0.000000e+00> : vector<64x256xf32>
    %12 = tpu.matmul %10, %11, %cst_8 {dimension_numbers = #tpu.dot_dimension_numbers<[1], [0], [0], [1], [0, 0, 1, 1], [], []>} : vector<64x128xbf16>, vector<128x256xbf16>, vector<64x256xf32> -> vector<64x256xf32>
    %c0_9 = arith.constant 0 : index
    %c0_10 = arith.constant 0 : index
    %13 = vector.load %arg5[%c0_9, %c0_10] : memref<64x1xf32, #tpu.memory_space<vmem>>, vector<64x1xf32>
    %14 = vector.broadcast %13 : vector<64x1xf32> to vector<64x256xf32>
    %15 = arith.addf %12, %14 : vector<64x256xf32>
    %cst_11 = arith.constant 0.000000e+00 : f32
    %16 = vector.broadcast %cst_11 : f32 to vector<64x256xf32>
    %17 = arith.maximumf %15, %16 : vector<64x256xf32>
    %c0_12 = arith.constant 0 : index
    %c0_13 = arith.constant 0 : index
    %18 = vector.load %arg6[%c0_12, %c0_13] : memref<16x64xbf16, #tpu.memory_space<vmem>>, vector<16x64xbf16>
    %19 = arith.truncf %17 : vector<64x256xf32> to vector<64x256xbf16>
    %cst_14 = arith.constant dense<0.000000e+00> : vector<16x256xf32>
    %20 = tpu.matmul %18, %19, %cst_14 {dimension_numbers = #tpu.dot_dimension_numbers<[1], [0], [0], [1], [0, 0, 1, 1], [], []>} : vector<16x64xbf16>, vector<64x256xbf16>, vector<16x256xf32> -> vector<16x256xf32>
    %c0_15 = arith.constant 0 : index
    %c0_16 = arith.constant 0 : index
    %21 = vector.load %arg7[%c0_15, %c0_16] : memref<16x1xf32, #tpu.memory_space<vmem>>, vector<16x1xf32>
    %22 = vector.broadcast %21 : vector<16x1xf32> to vector<16x256xf32>
    %23 = arith.addf %20, %22 : vector<16x256xf32>
    %cst_17 = arith.constant 0.000000e+00 : f32
    %24 = vector.broadcast %cst_17 : f32 to vector<16x256xf32>
    %25 = arith.maximumf %23, %24 : vector<16x256xf32>
    %c0_18 = arith.constant 0 : index
    %c0_19 = arith.constant 0 : index
    %26 = vector.load %arg8[%c0_18, %c0_19] : memref<16x1xbf16, #tpu.memory_space<vmem>>, vector<16x1xbf16>
    %27 = arith.extf %26 : vector<16x1xbf16> to vector<16x1xf32>
    %28 = vector.broadcast %27 : vector<16x1xf32> to vector<16x256xf32>
    %29 = arith.mulf %25, %28 : vector<16x256xf32>
    %cst_20 = arith.constant dense<0.000000e+00> : vector<256xf32>
    %30 = vector.multi_reduction <add>, %29, %cst_20 [0] : vector<16x256xf32> to vector<256xf32>
    %31 = vector.shape_cast %30 : vector<256xf32> to vector<1x256xf32>
    %c0_21 = arith.constant 0 : index
    %c0_22 = arith.constant 0 : index
    %32 = vector.load %arg9[%c0_21, %c0_22] : memref<1x1xf32, #tpu.memory_space<vmem>>, vector<1x1xf32>
    %33 = vector.broadcast %32 : vector<1x1xf32> to vector<1x256xf32>
    %34 = arith.addf %31, %33 : vector<1x256xf32>
    %c0_23 = arith.constant 0 : index
    %c0_24 = arith.constant 0 : index
    %35 = vector.load %arg10[%c0_23, %c0_24] : memref<1x256xf32, #tpu.memory_space<vmem>>, vector<1x256xf32>
    tpu.vector_store %arg10[%c0_23, %c0_24], %34 {strides = array<i32>} : memref<1x256xf32, #tpu.memory_space<vmem>>, vector<1x256xf32>,
    return
  }
  func.func @transform_0(%arg0: i32) -> (i32, i32) {
    %c0_i32 = arith.constant 0 : i32
    %c0_i32_0 = arith.constant 0 : i32
    return %arg0, %c0_i32 : i32, i32
  }
  func.func @transform_1(%arg0: i32) -> (i32, i32) {
    %c0_i32 = arith.constant 0 : i32
    %c0_i32_0 = arith.constant 0 : i32
    %c0_i32_1 = arith.constant 0 : i32
    return %c0_i32, %c0_i32_0 : i32, i32
  }
  func.func @transform_2(%arg0: i32) -> (i32, i32) {
    %c0_i32 = arith.constant 0 : i32
    %c0_i32_0 = arith.constant 0 : i32
    %c0_i32_1 = arith.constant 0 : i32
    return %c0_i32, %c0_i32_0 : i32, i32
  }
  func.func @transform_3(%arg0: i32) -> (i32, i32) {
    %c0_i32 = arith.constant 0 : i32
    %c0_i32_0 = arith.constant 0 : i32
    %c0_i32_1 = arith.constant 0 : i32
    return %c0_i32, %c0_i32_0 : i32, i32
  }
  func.func @transform_4(%arg0: i32) -> (i32, i32) {
    %c0_i32 = arith.constant 0 : i32
    %c0_i32_0 = arith.constant 0 : i32
    %c0_i32_1 = arith.constant 0 : i32
    return %c0_i32, %c0_i32_0 : i32, i32
  }
  func.func @transform_5(%arg0: i32) -> (i32, i32) {
    %c0_i32 = arith.constant 0 : i32
    %c0_i32_0 = arith.constant 0 : i32
    %c0_i32_1 = arith.constant 0 : i32
    return %c0_i32, %c0_i32_0 : i32, i32
  }
  func.func @transform_6(%arg0: i32) -> (i32, i32) {
    %c0_i32 = arith.constant 0 : i32
    %c0_i32_0 = arith.constant 0 : i32
    %c0_i32_1 = arith.constant 0 : i32
    return %c0_i32, %c0_i32_0 : i32, i32
  }
  func.func @transform_7(%arg0: i32) -> (i32, i32) {
    %c0_i32 = arith.constant 0 : i32
    %c0_i32_0 = arith.constant 0 : i32
    %c0_i32_1 = arith.constant 0 : i32
    return %c0_i32, %c0_i32_0 : i32, i32
  }
  func.func @transform_8(%arg0: i32) -> (i32, i32) {
    %c0_i32 = arith.constant 0 : i32
    %c0_i32_0 = arith.constant 0 : i32
    %c0_i32_1 = arith.constant 0 : i32
    return %c0_i32, %c0_i32_0 : i32, i32
  }
  func.func @transform_9(%arg0: i32) -> (i32, i32) {
    %c0_i32 = arith.constant 0 : i32
    %c0_i32_0 = arith.constant 0 : i32
    return %c0_i32, %arg0 : i32, i32
  }
}

</mosaic_0001>

<bundles_post_ra>
// kernel: g_factor_predictor.1
= control target key start
LH: loop header
LB: loop body
LE: loop exit
PB: predicated region body
PF: predicated region fallthrough
CT: control target
= control target key end

     0   :  { %s1801_s0 = inlined_call_operand.vmem [shape: f32[300,9], index: 0, kind: input, shape index: {}]   ;;  %s1802_s1 = inlined_call_operand.vmem [shape: bf16[9,128], index: 1, kind: input, shape index: {}]   ;;  %s1803_s2 = inlined_call_operand.vmem [shape: f32[1,128], index: 2, kind: input, shape index: {}]   ;;  %s1804_s3 = inlined_call_operand.vmem [shape: bf16[64,128], index: 3, kind: input, shape index: {}]   ;;  %s1805_s4 = inlined_call_operand.vmem [shape: f32[64,1], index: 4, kind: input, shape index: {}]   ;;  %s1806_s5 = inlined_call_operand.vmem [shape: bf16[16,64], index: 5, kind: input, shape index: {}]   ;;  %s1807_s6 = inlined_call_operand.vmem [shape: f32[16,1], index: 6, kind: input, shape index: {}]   ;;  %s1808_s7 = inlined_call_operand.vmem [shape: bf16[16,1], index: 7, kind: input, shape index: {}]   ;;  %s1809_s8 = inlined_call_operand.<no memory space> [shape: f32[1,1], index: 8, kind: input, shape index: {}]   ;;  %s1810_s9 = inlined_call_operand.hbm [shape: f32[1,300], index: 9, kind: output, shape index: {}]  }
   0x1   :  { %v14_v0 = vstv %s1809_s8 }
   0x2   :  { %15 = vst [vmem:[#allocation2] sm:$0x1] %v14_v0 }
   0x3   :  { %16 = vsyncpa [#allocation4], 0 }
   0x4   :  { %18 = vsyncpa [#allocation4 + $0x1], 0  ;;  %s1526_s11 = smov 0   ;;  %s1528_s12 = smov 0  }
   0x5   :  { %s1530_s13 = smov 0   ;;  %s1532_s14 = smov 0  }
   0x6 LB: > { %s1547_s8 = sadd.s32 4294967295, %s1467_s14   ;;  %s1145_s15 = sadd.s32 4294967294, %s1467_s14   ;;  %s1467_s14 = sphi %s1532_s14, %s1816_s14   ;;  %s1463_s13 = sphi %s1530_s13, %s1815_s13   ;;  %s1459_s12 = sphi %s1528_s12, %s1814_s12   ;;  %s1455_s11 = sphi %s1526_s11, %s1813_s11  }
   0x7   : > { %s1551_s16 = sadd.s32 1, %s1467_s14   ;;  %s225_s17 = sadd.s32 1, %s1463_s13 }
   0x8   : > { %s222_s18 = ssub.s32 %s1467_s14, %s1551_s16  ;;  %p235_p0 = scmp.ne.s32.totalorder %s1463_s13, %s1459_s12 }
   0x9   : > { %p223_p1 = scmp.eq.s32.totalorder %s222_s18, 0  ;;  %p236_p2 = scmp.eq.s32.totalorder %s1547_s8, 1 }
   0xa   : > { %p241_p3 = scmp.ne.s32.totalorder %s1459_s12, %s1455_s11  ;;  %p242_p4 = scmp.eq.s32.totalorder %s1145_s15, 1 }
   0xb   : > { %s1562_s19 = scalar_select %p223_p1, %s1463_s13, %s225_s17  }
   0xc   : > { %p1564_p5 = por %p236_p2, %p235_p0  ;;  %p1568_p6 = por %p242_p4, %p241_p3 }
   0xd   : > { %p1148_p7 = scmp.ge.s32.totalorder %s1467_s14, 1  ;;  %p301_p8 = scmp.lt.s32.totalorder %s1467_s14, 3 }
   0xf   : > { %p302_p9 = pnand %p1148_p7, %p301_p8 }
  0x10   : > { %v1399_v1 = vld [vmem:[%s1802_s1] sm:$0x1f] (!%p302_p9)   ;;  %vm472_vm0 = vcmask (!%p302_p9), 1043456   ;;  %vm473_vm1 = vcmask (!%p302_p9), 1044480   ;;  %s1578_s24 = sshll.u32 (!%p302_p9), %s1547_s8, 5  ;;  %v1469_v2 = vmov (!%p302_p9), 65535  }
  0x11   : > { %305 = sbr.rel (%p302_p9) target bundleno = 1000 (0x3e8), region = 56  ;;  %v474_v3 = vsel (!%p302_p9), %vm472_vm0, 4294967295, %v1469_v2  ;;  %p346_p10 = scmp.lt.s32.totalorder (!%p302_p9), %s1578_s24, 37  ;;  %vm423_vm2 = vcmask (!%p302_p9), 72704   ;;  %vm948_vm3 = vcmask (!%p302_p9), 523264  }
  0x12   : > { %v475_v4 = vsel (!%p302_p9), %vm473_vm1, %v474_v3, 0  ;;  %s338_s28 = sand.u32 (!%p302_p9), 1, %s1459_s12  }
  0x13   : > { %v477_v5 = vand.u32 (!%p302_p9), %v1399_v1, %v475_v4  ;;  %s1747_s10 = scalar_lea.sflag (!%p302_p9), [#allocation4], %s338_s28 }
  0x15   : > { %1205 = vmatprep.subr.bf16.mxu0 (!%p302_p9), %v477_v5 }
  0x16   : > { %1206 = vmatpush3.bf16.msra.mxu0 (!%p302_p9), %v477_v5 }
  0x18   : > { %s347_s25 = scalar_select %p346_p10, %s1578_s24, 37 }
  0x19   : > { %s1177_s15 = sshll.u32 (%p1564_p5), %s1547_s8, 1 }
  0x1a   : > { %s1151_s26 = sshll.u32 %s347_s25, 3  ;;  %s1075_s17 = ssub.s32 (%p1564_p5), 3, %s1177_s15 }
  0x1b   : > { %s1585_s29 = scalar_lea.vmem %s1801_s0, %s1151_s26  ;;  %p1076_p11 = scmp.lt.s32.totalorder (%p1564_p5), %s1075_s17, 2 }
  0x1c   : > { %v361_v6 = vld [vmem:[%s1585_s29] sm:$0xff]  ;;  %v362_v7 = vld [vmem:[%s1585_s29 + $0x8] sm:$0xff]  ;;  %v363_v8 = vld [vmem:[%s1585_s29 + $0x10] sm:$0xff] }
  0x1d   : > { %v393_v9 = vpack.c.bf16 %v362_v7, %v361_v6  ;;  %v364_v10 = vld [vmem:[%s1585_s29 + $0x18] sm:$0xff]  ;;  %v365_v11 = vld [vmem:[%s1585_s29 + $0x20] sm:$0xff]  ;;  %v366_v12 = vld [vmem:[%s1585_s29 + $0x28] sm:$0xff] }
  0x1e   : > { %v394_v13 = vpack.c.bf16 %v364_v10, %v363_v8  ;;  %v395_v14 = vpack.c.bf16 %v366_v12, %v365_v11  ;;  %v367_v15 = vld [vmem:[%s1585_s29 + $0x30] sm:$0xff]  ;;  %v368_v16 = vld [vmem:[%s1585_s29 + $0x38] sm:$0xff]  ;;  %v369_v17 = vld [vmem:[%s1585_s29 + $0x40] sm:$0xff] }
  0x1f   : > { %1207 = vmatprep.mubr.msk.bf16.mxu0 %vm423_vm2, %v393_v9  ;;  %v370_v18 = vld [vmem:[%s1585_s29 + $0x48] sm:$0xff]  ;;  %v396_v19 = vpack.c.bf16 %v368_v16, %v367_v15  ;;  %v371_v21 = vld [vmem:[%s1585_s29 + $0x50] sm:$0xff]  ;;  %v372_v22 = vld [vmem:[%s1585_s29 + $0x58] sm:$0xff] }
  0x20   : > { %1208 = vmatmul.mubr.msk.bf16.vlgmr.msra.gmra.mrb[0].mxu0 %vm423_vm2, %v394_v13  ;;  %v397_v20 = vpack.c.bf16 %v370_v18, %v369_v17  ;;  %v373_v23 = vld [vmem:[%s1585_s29 + $0x60] sm:$0xff]  ;;  %v374_v24 = vld [vmem:[%s1585_s29 + $0x68] sm:$0xff]  ;;  %v398_v25 = vpack.c.bf16 %v372_v22, %v371_v21  ;;  %v375_v27 = vld [vmem:[%s1585_s29 + $0x70] sm:$0xff] }
  0x21   : > { %1211 = vmatprep.mubr.msk.bf16.mxu0 %vm423_vm2, %v395_v14  ;;  %v399_v26 = vpack.c.bf16 %v374_v24, %v373_v23  ;;  %v376_v28 = vld [vmem:[%s1585_s29 + $0x78] sm:$0xff]  ;;  %v377_v29 = vld [vmem:[%s1585_s29 + $0x80] sm:$0xff]  ;;  %v378_v30 = vld [vmem:[%s1585_s29 + $0x88] sm:$0xff] }
  0x22   : > { %v400_v31 = vpack.c.bf16 %v376_v28, %v375_v27  ;;  %v401_v32 = vpack.c.bf16 %v378_v30, %v377_v29  ;;  %v379_v33 = vld [vmem:[%s1585_s29 + $0x90] sm:$0xff]  ;;  %v380_v34 = vld [vmem:[%s1585_s29 + $0x98] sm:$0xff]  ;;  %v381_v35 = vld [vmem:[%s1585_s29 + $0xa0] sm:$0xff] }
  0x23   : > { %v382_v36 = vld [vmem:[%s1585_s29 + $0xa8] sm:$0xff]  ;;  %v402_v37 = vpack.c.bf16 %v380_v34, %v379_v33  ;;  %v383_v39 = vld [vmem:[%s1585_s29 + $0xb0] sm:$0xff]  ;;  %v384_v40 = vld [vmem:[%s1585_s29 + $0xb8] sm:$0xff] }
  0x24   : > { %v403_v38 = vpack.c.bf16 %v382_v36, %v381_v35  ;;  %v385_v41 = vld [vmem:[%s1585_s29 + $0xc0] sm:$0xff]  ;;  %v386_v42 = vld [vmem:[%s1585_s29 + $0xc8] sm:$0xff]  ;;  %v404_v43 = vpack.c.bf16 %v384_v40, %v383_v39  ;;  %v387_v45 = vld [vmem:[%s1585_s29 + $0xd0] sm:$0xff] }
  0x25   : > { %v405_v44 = vpack.c.bf16 %v386_v42, %v385_v41  ;;  %v388_v46 = vld [vmem:[%s1585_s29 + $0xd8] sm:$0xff]  ;;  %v389_v47 = vld [vmem:[%s1585_s29 + $0xe0] sm:$0xff]  ;;  %v390_v48 = vld [vmem:[%s1585_s29 + $0xe8] sm:$0xff] }
  0x26   : > { %v406_v49 = vpack.c.bf16 %v388_v46, %v387_v45  ;;  %v407_v50 = vpack.c.bf16 %v390_v48, %v389_v47  ;;  %v391_v51 = vld [vmem:[%s1585_s29 + $0xf0] sm:$0xff]  ;;  %v392_v52 = vld [vmem:[%s1585_s29 + $0xf8] sm:$0xff]  ;;  %v1648_v6 = vld [vmem:[%s1803_s2] ss:$0 sm:$0xff]  ;;  %s1149_s29 = sshll.u32 %s338_s28, 1 }
  0x27   : > { %v408_v53 = vpack.c.bf16 %v392_v52, %v391_v51  ;;  %s340_s30 = scalar_lea.vmem [#allocation3], %s1149_s29 }
  0x28   : > { %1212 = vmatmul.mubr.msk.bf16.gmra.mrb[4].mxu0 %vm423_vm2, %v396_v19 }
  0x29   : > { %1215 = vmatprep.mubr.msk.bf16.mxu0 %vm423_vm2, %v397_v20 }
  0x30   : > { %1216 = vmatmul.mubr.msk.bf16.gmra.mrb[8].mxu0 %vm423_vm2, %v398_v25 }
  0x31   : > { %1219 = vmatprep.mubr.msk.bf16.mxu0 %vm423_vm2, %v399_v26 }
  0x38   : > { %1220 = vmatmul.mubr.msk.bf16.gmra.mrb[12].mxu0 %vm423_vm2, %v400_v31 }
  0x39   : > { %1223 = vmatprep.mubr.msk.bf16.mxu0 %vm423_vm2, %v401_v32 }
  0x40   : > { %1224 = vmatmul.mubr.msk.bf16.gmra.mrb[16].mxu0 %vm423_vm2, %v402_v37 }
  0x41   : > { %1227 = vmatprep.mubr.msk.bf16.mxu0 %vm423_vm2, %v403_v38 }
  0x48   : > { %1228 = vmatmul.mubr.msk.bf16.gmra.mrb[20].mxu0 %vm423_vm2, %v404_v43 }
  0x49   : > { %1231 = vmatprep.mubr.msk.bf16.mxu0 %vm423_vm2, %v405_v44 }
  0x50   : > { %1232 = vmatmul.mubr.msk.bf16.gmra.mrb[24].mxu0 %vm423_vm2, %v406_v49 }
  0x51   : > { %1235 = vmatprep.mubr.msk.bf16.mxu0 %vm423_vm2, %v407_v50 }
  0x58   : > { %1236 = vmatmul.mubr.msk.bf16.gmra.mrb[28].mxu0 %vm423_vm2, %v408_v53 }
  0xf3   : > { %v1209_v54 = vpop.f32.mrb[0].mxu0 }
  0xf4   : > { %v513_v55 = vpop.f32.mrb[1].mxu0  ;;  %v522_v7 = vadd.f32 %v1209_v54, %v1648_v6 }
  0xf5   : > { %v1210_v56 = vpop.f32.mrb[2].mxu0  ;;  %v514_v8 = vadd.f32 %v1648_v6, %v513_v55 }
  0xf6   : > { %v516_v57 = vpop.f32.mrb[3].mxu0  ;;  %v525_v10 = vadd.f32 %v1210_v56, %v1648_v6  ;;  %v642_v16 = vmax.f32 %v522_v7, 0.0 }
  0xf7   : > { %v517_v13 = vadd.f32 %v1648_v6, %v516_v57  ;;  %v640_v20 = vmax.f32 %v514_v8, 0.0 }
  0xf8   : > { %v643_v23 = vmax.f32 %v525_v10, 0.0 }
  0xf9   : > { %v641_v26 = vmax.f32 %v517_v13, 0.0 }
  0xfb   : > { %v1213_v58 = vpop.f32.mrb[4].mxu0 }
  0xfc   : > { %v529_v59 = vpop.f32.mrb[5].mxu0  ;;  %v538_v29 = vadd.f32 %v1213_v58, %v1648_v6 }
  0xfd   : > { %v1214_v60 = vpop.f32.mrb[6].mxu0  ;;  %v530_v31 = vadd.f32 %v1648_v6, %v529_v59 }
  0xfe   : > { %v532_v61 = vpop.f32.mrb[7].mxu0  ;;  %v541_v34 = vadd.f32 %v1214_v60, %v1648_v6  ;;  %v646_v40 = vmax.f32 %v538_v29, 0.0 }
  0xff   : > { %v533_v37 = vadd.f32 %v1648_v6, %v532_v61  ;;  %v644_v44 = vmax.f32 %v530_v31, 0.0 }
 0x100   : > { %v647_v47 = vmax.f32 %v541_v34, 0.0 }
 0x101   : > { %v645_v50 = vmax.f32 %v533_v37, 0.0 }
 0x103   : > { %v1217_v62 = vpop.f32.mrb[8].mxu0 }
 0x104   : > { %v545_v63 = vpop.f32.mrb[9].mxu0  ;;  %v554_v53 = vadd.f32 %v1217_v62, %v1648_v6 }
 0x105   : > { %v1218_v0 = vpop.f32.mrb[10].mxu0  ;;  %v546_v55 = vadd.f32 %v1648_v6, %v545_v63 }
 0x106   : > { %v1635_v1 = vpop.f32.mrb[11].mxu0  ;;  %v557_v58 = vadd.f32 %v1218_v0, %v1648_v6 }
 0x107   : > { %v549_v61 = vadd.f32 %v1648_v6, %v1635_v1  ;;  %v648_v63 = vmax.f32 %v546_v55, 0.0 }
 0x108   : > { %v651_v0 = vmax.f32 %v557_v58, 0.0 }
 0x10b   : > { %v1637_v2 = vpop.f32.mrb[12].mxu0 }
 0x10c   : > { %v1639_v3 = vpop.f32.mrb[13].mxu0  ;;  %v570_v1 = vadd.f32 %v1637_v2, %v1648_v6 }
 0x10d   : > { %v1641_v4 = vpop.f32.mrb[14].mxu0 }
 0x10e   : > { %v1643_v5 = vpop.f32.mrb[15].mxu0  ;;  %v654_v2 = vmax.f32 %v570_v1, 0.0 }
 0x113   : > { %v1225_v9 = vpop.f32.mrb[16].mxu0 }
 0x114   : > { %v586_v11 = vadd.f32 %v1225_v9, %v1648_v6  ;;  %v577_v12 = vpop.f32.mrb[17].mxu0  ;;  %v650_v9 = vmax.f32 %v554_v53, 0.0 }
 0x115   : > { %v578_v14 = vadd.f32 %v1648_v6, %v577_v12  ;;  %v1226_v15 = vpop.f32.mrb[18].mxu0 }
 0x116   : > { %v658_v17 = vmax.f32 %v586_v11, 0.0  ;;  %v589_v18 = vadd.f32 %v1226_v15, %v1648_v6  ;;  %v580_v19 = vpop.f32.mrb[19].mxu0 }
 0x117   : > { %v656_v21 = vmax.f32 %v578_v14, 0.0  ;;  %v581_v22 = vadd.f32 %v1648_v6, %v580_v19 }
 0x118   : > { %v659_v24 = vmax.f32 %v589_v18, 0.0  ;;  %v1284_v25 = vpack.i.bf16 %v642_v16, %v658_v17  ;;  %v649_v16 = vmax.f32 %v549_v61, 0.0 }
 0x119   : > { %v657_v27 = vmax.f32 %v581_v22, 0.0  ;;  %v1280_v28 = vpack.i.bf16 %v640_v20, %v656_v21  ;;  %v562_v20 = vadd.f32 %v1648_v6, %v1639_v3 }
 0x11a   : > { %v1286_v30 = vpack.i.bf16 %v643_v23, %v659_v24  ;;  %v573_v23 = vadd.f32 %v1641_v4, %v1648_v6 }
 0x11b   : > { %v1229_v32 = vpop.f32.mrb[20].mxu0  ;;  %1281 = vxpose.xlu0.b32.start [1/16] %v1280_v28, 128  ;;  %v1282_v33 = vpack.i.bf16 %v641_v26, %v657_v27  ;;  %v565_v26 = vadd.f32 %v1648_v6, %v1643_v5  ;;  %v652_v31 = vmax.f32 %v562_v20, 0.0 }
 0x11c   : > { %v602_v35 = vadd.f32 %v1229_v32, %v1648_v6  ;;  %v593_v36 = vpop.f32.mrb[21].mxu0  ;;  %v655_v4 = vmax.f32 %v573_v23, 0.0 }
 0x11d   : > { %v594_v38 = vadd.f32 %v1648_v6, %v593_v36  ;;  %v1230_v39 = vpop.f32.mrb[22].mxu0  ;;  %v653_v36 = vmax.f32 %v565_v26, 0.0 }
 0x11e   : > { %v662_v41 = vmax.f32 %v602_v35, 0.0  ;;  %v605_v42 = vadd.f32 %v1230_v39, %v1648_v6  ;;  %v596_v43 = vpop.f32.mrb[23].mxu0 }
 0x11f   : > { %v660_v45 = vmax.f32 %v594_v38, 0.0  ;;  %v597_v46 = vadd.f32 %v1648_v6, %v596_v43  ;;  %1283 = vxpose.xlu0.b32.cont [2/16] %v1282_v33, 128  ;;  %v763_v43 = vld [vmem:[%s1805_s4 + $0x18] sm:$0xff] }
 0x120   : > { %v663_v48 = vmax.f32 %v605_v42, 0.0  ;;  %v1292_v49 = vpack.i.bf16 %v646_v40, %v662_v41  ;;  %v760_v40 = vld [vmem:[%s1805_s4] sm:$0xff]  ;;  %v761_v41 = vld [vmem:[%s1805_s4 + $0x8] sm:$0xff]  ;;  %v762_v42 = vld [vmem:[%s1805_s4 + $0x10] sm:$0xff] }
 0x121   : > { %v661_v51 = vmax.f32 %v597_v46, 0.0  ;;  %v1288_v52 = vpack.i.bf16 %v644_v44, %v660_v45  ;;  %v764_v44 = vld [vmem:[%s1805_s4 + $0x20] sm:$0xff]  ;;  %v765_v45 = vld [vmem:[%s1805_s4 + $0x28] sm:$0xff]  ;;  %v766_v46 = vld [vmem:[%s1805_s4 + $0x30] sm:$0xff] }
 0x122   : > { %v1294_v54 = vpack.i.bf16 %v647_v47, %v663_v48  ;;  %v767_v47 = vld [vmem:[%s1805_s4 + $0x38] sm:$0xff]  ;;  %v931_v48 = vld [vmem:[%s1807_s6] sm:$0xff] }
 0x123   : > { %v1233_v56 = vpop.f32.mrb[24].mxu0  ;;  %1285 = vxpose.xlu0.b32.cont [3/16] %v1284_v25, 128  ;;  %v1290_v57 = vpack.i.bf16 %v645_v50, %v661_v51 }
 0x124   : > { %v618_v59 = vadd.f32 %v1233_v56, %v1648_v6  ;;  %v609_v60 = vpop.f32.mrb[25].mxu0 }
 0x125   : > { %v610_v7 = vadd.f32 %v1648_v6, %v609_v60  ;;  %v1234_v8 = vpop.f32.mrb[26].mxu0 }
 0x126   : > { %v666_v10 = vmax.f32 %v618_v59, 0.0  ;;  %v621_v62 = vadd.f32 %v1234_v8, %v1648_v6  ;;  %v612_v11 = vpop.f32.mrb[27].mxu0 }
 0x127   : > { %v664_v12 = vmax.f32 %v610_v7, 0.0  ;;  %v613_v13 = vadd.f32 %v1648_v6, %v612_v11  ;;  %1287 = vxpose.xlu0.b32.cont [4/16] %v1286_v30, 128  ;;  %v1031_v7 = vld [vmem:[#allocation2] sm:$0x1] }
 0x128   : > { %v667_v14 = vmax.f32 %v621_v62, 0.0  ;;  %v1300_v15 = vpack.i.bf16 %v650_v9, %v666_v10 }
 0x129   : > { %v665_v17 = vmax.f32 %v613_v13, 0.0  ;;  %v1296_v18 = vpack.i.bf16 %v648_v63, %v664_v12 }
 0x12a   : > { %v1302_v19 = vpack.i.bf16 %v651_v0, %v667_v14 }
 0x12b   : > { %v1237_v21 = vpop.f32.mrb[28].mxu0  ;;  %1289 = vxpose.xlu0.b32.cont [5/16] %v1288_v52, 128  ;;  %v1298_v22 = vpack.i.bf16 %v649_v16, %v665_v17  ;;  %v932_v52 = vld [vmem:[%s1807_s6 + $0x8] sm:$0xff] }
 0x12c   : > { %v634_v24 = vadd.f32 %v1237_v21, %v1648_v6  ;;  %v625_v25 = vpop.f32.mrb[29].mxu0 }
 0x12d   : > { %v626_v27 = vadd.f32 %v1648_v6, %v625_v25  ;;  %v1238_v28 = vpop.f32.mrb[30].mxu0 }
 0x12e   : > { %v670_v29 = vmax.f32 %v634_v24, 0.0  ;;  %v637_v30 = vadd.f32 %v1238_v28, %v1648_v6  ;;  %v628_v3 = vpop.f32.mrb[31].mxu0 }
 0x12f   : > { %v668_v32 = vmax.f32 %v626_v27, 0.0  ;;  %v629_v33 = vadd.f32 %v1648_v6, %v628_v3  ;;  %1291 = vxpose.xlu0.b32.cont [6/16] %v1290_v57, 128  ;;  %v1470_v6 = vmov 0  }
 0x130   : > { %v671_v34 = vmax.f32 %v637_v30, 0.0  ;;  %v1308_v35 = vpack.i.bf16 %v654_v2, %v670_v29  ;;  %864 = vmatprep.mubr.bf16.mxu1 %v1470_v6  ;;  %1392 = vset.pattern.permute.xlu1 %v1470_v6 }
 0x131   : > { %v669_v37 = vmax.f32 %v629_v33, 0.0  ;;  %v1304_v38 = vpack.i.bf16 %v652_v31, %v668_v32  ;;  %770 = vperm.xlu1 %1392, %v760_v40  }
 0x132   : > { %v1310_v5 = vpack.i.bf16 %v655_v4, %v671_v34 }
 0x133   : > { %1293 = vxpose.xlu0.b32.cont [7/16] %v1292_v49, 128  ;;  %v1306_v39 = vpack.i.bf16 %v653_v36, %v669_v37  ;;  %v1185_v49 = vld [vmem:[%s1808_s7] sm:$0xff]  }
 0x134   : > { %v1186_v50 = vunpack.c.l.bf16 %v1185_v49  ;;  %v1187_v51 = vunpack.c.h.bf16 %v1185_v49 }
 0x135   : > { %775 = vperm.xlu1 %1392, %v761_v41  }
 0x137   : > { %1295 = vxpose.xlu0.b32.cont [8/16] %v1294_v54, 128  ;;  %v1393_v54 = vpack.i.bf16 %v1187_v51, %v1186_v50 }
 0x139   : > { %780 = vperm.xlu1 %1392, %v762_v42  }
 0x13b   : > { %1297 = vxpose.xlu0.b32.cont [9/16] %v1296_v18, 128 }
 0x13d   : > { %785 = vperm.xlu1 %1392, %v763_v43  }
 0x13f   : > { %1299 = vxpose.xlu0.b32.cont [10/16] %v1298_v22, 128 }
 0x141   : > { %790 = vperm.xlu1 %1392, %v764_v44  }
 0x143   : > { %1301 = vxpose.xlu0.b32.cont [11/16] %v1300_v15, 128 }
 0x145   : > { %795 = vperm.xlu1 %1392, %v765_v45  }
 0x147   : > { %1303 = vxpose.xlu0.b32.cont [12/16] %v1302_v19, 128 }
 0x149   : > { %800 = vperm.xlu1 %1392, %v766_v46  }
 0x14b   : > { %1305 = vxpose.xlu0.b32.cont [13/16] %v1304_v38, 128 }
 0x14d   : > { %805 = vperm.xlu1 %1392, %v767_v47  }
 0x14f   : > { %1307 = vxpose.xlu0.b32.cont [14/16] %v1306_v39, 128 }
 0x151   : > { %935 = vperm.xlu1 %1392, %v931_v48  }
 0x153   : > { %1309 = vxpose.xlu0.b32.cont [15/16] %v1308_v35, 128 }
 0x155   : > { %940 = vperm.xlu1 %1392, %v932_v52  }
 0x157   : > { %1311 = vxpose.xlu0.b32.end [16/16] %v1310_v5, 128 }
 0x159   : > { %1394 = vperm.xlu1 %1392, %v1393_v54  }
 0x15d   : > { %1034 = vperm.xlu1 %1392, %v1031_v7  }
 0x180   : > { %1398 = vset.pattern.permute.xlu0 %v1470_v6 }
 0x19b   : > { %v1312_v53 = vpop.trf.xlu0 }
 0x19c   : > { %v1313_v56 = vunpack.i.l.bf16 %v1312_v53  ;;  %v1316_v57 = vunpack.i.h.bf16 %v1312_v53 }
 0x19f   : > { %v1317_v55 = vpop.trf.xlu0 }
 0x1a0   : > { %v1318_v58 = vunpack.i.l.bf16 %v1317_v55  ;;  %v1321_v59 = vunpack.i.h.bf16 %v1317_v55 }
 0x1a2   : > { %v745_v60 = vpack.c.bf16 %v1318_v58, %v1313_v56  ;;  %v744_v61 = vpack.c.bf16 %v1321_v59, %v1316_v57  ;;  %v1400_v56 = vld [vmem:[%s1804_s3] sm:$0xff]   ;;  %v1401_v57 = vld [vmem:[%s1804_s3 + $0x8] sm:$0xff]   ;;  %v1402_v58 = vld [vmem:[%s1804_s3 + $0x10] sm:$0xff]  }
 0x1a3   : > { %v1322_v8 = vpop.trf.xlu0  ;;  %v1403_v59 = vld [vmem:[%s1804_s3 + $0x18] sm:$0xff]  }
 0x1a4   : > { %832 = vmatprep.subr.bf16.mxu1 %v745_v60  ;;  %v1326_v9 = vunpack.i.h.bf16 %v1322_v8  ;;  %v1323_v10 = vunpack.i.l.bf16 %v1322_v8 }
 0x1a5   : > { %833 = vmatpush1.bf16.msra.mxu1 %v744_v61 }
 0x1a7   : > { %v1327_v62 = vpop.trf.xlu0 }
 0x1a8   : > { %v1331_v11 = vunpack.i.h.bf16 %v1327_v62  ;;  %v1328_v63 = vunpack.i.l.bf16 %v1327_v62 }
 0x1aa   : > { %v747_v12 = vpack.c.bf16 %v1328_v63, %v1323_v10  ;;  %v746_v13 = vpack.c.bf16 %v1331_v11, %v1326_v9 }
 0x1ab   : > { %v1332_v0 = vpop.trf.xlu0 }
 0x1ac   : > { %834 = vmatprep.subr.bf16.mxu1 %v747_v12  ;;  %v1336_v14 = vunpack.i.h.bf16 %v1332_v0  ;;  %v1333_v15 = vunpack.i.l.bf16 %v1332_v0 }
 0x1ad   : > { %835 = vmatpush1.bf16.msra.mxu1 %v746_v13 }
 0x1af   : > { %v1337_v16 = vpop.trf.xlu0 }
 0x1b0   : > { %v1341_v17 = vunpack.i.h.bf16 %v1337_v16  ;;  %v1338_v18 = vunpack.i.l.bf16 %v1337_v16  ;;  %v771_v60 = vpop.permute.xlu1 %770 }
 0x1b2   : > { %v749_v1 = vpack.c.bf16 %v1338_v18, %v1333_v15  ;;  %v748_v19 = vpack.c.bf16 %v1341_v17, %v1336_v14 }
 0x1b3   : > { %v1342_v20 = vpop.trf.xlu0 }
 0x1b4   : > { %836 = vmatprep.subr.bf16.mxu1 %v749_v1  ;;  %v1346_v21 = vunpack.i.h.bf16 %v1342_v20  ;;  %v1343_v22 = vunpack.i.l.bf16 %v1342_v20  ;;  %v776_v61 = vpop.permute.xlu1 %775 }
 0x1b5   : > { %837 = vmatpush1.bf16.msra.mxu1 %v748_v19 }
 0x1b7   : > { %v1347_v23 = vpop.trf.xlu0 }
 0x1b8   : > { %v1351_v24 = vunpack.i.h.bf16 %v1347_v23  ;;  %v1348_v25 = vunpack.i.l.bf16 %v1347_v23  ;;  %v781_v7 = vpop.permute.xlu1 %780 }
 0x1ba   : > { %v751_v26 = vpack.c.bf16 %v1348_v25, %v1343_v22  ;;  %v750_v27 = vpack.c.bf16 %v1351_v24, %v1346_v21 }
 0x1bb   : > { %v1352_v28 = vpop.trf.xlu0 }
 0x1bc   : > { %838 = vmatprep.subr.bf16.mxu1 %v751_v26  ;;  %v1356_v2 = vunpack.i.h.bf16 %v1352_v28  ;;  %v1353_v29 = vunpack.i.l.bf16 %v1352_v28  ;;  %v786_v62 = vpop.permute.xlu1 %785 }
 0x1bd   : > { %839 = vmatpush1.bf16.msra.mxu1 %v750_v27 }
 0x1bf   : > { %v1357_v30 = vpop.trf.xlu0 }
 0x1c0   : > { %v1361_v3 = vunpack.i.h.bf16 %v1357_v30  ;;  %v1358_v31 = vunpack.i.l.bf16 %v1357_v30  ;;  %v791_v1 = vpop.permute.xlu1 %790 }
 0x1c2   : > { %v753_v32 = vpack.c.bf16 %v1358_v31, %v1353_v29  ;;  %v752_v33 = vpack.c.bf16 %v1361_v3, %v1356_v2 }
 0x1c3   : > { %v1362_v4 = vpop.trf.xlu0 }
 0x1c4   : > { %840 = vmatprep.subr.bf16.mxu1 %v753_v32  ;;  %v1366_v34 = vunpack.i.h.bf16 %v1362_v4  ;;  %v1363_v35 = vunpack.i.l.bf16 %v1362_v4  ;;  %v796_v2 = vpop.permute.xlu1 %795 }
 0x1c5   : > { %841 = vmatpush1.bf16.msra.mxu1 %v752_v33 }
 0x1c7   : > { %v1367_v36 = vpop.trf.xlu0 }
 0x1c8   : > { %v1371_v37 = vunpack.i.h.bf16 %v1367_v36  ;;  %v1368_v38 = vunpack.i.l.bf16 %v1367_v36 }
 0x1ca   : > { %v755_v5 = vpack.c.bf16 %v1368_v38, %v1363_v35  ;;  %v754_v39 = vpack.c.bf16 %v1371_v37, %v1366_v34  ;;  %v801_v38 = vpop.permute.xlu1 %800 }
 0x1cb   : > { %v1372_v40 = vpop.trf.xlu0 }
 0x1cc   : > { %842 = vmatprep.subr.bf16.mxu1 %v755_v5  ;;  %v1376_v41 = vunpack.i.h.bf16 %v1372_v40  ;;  %v1373_v42 = vunpack.i.l.bf16 %v1372_v40 }
 0x1cd   : > { %843 = vmatpush1.bf16.msra.mxu1 %v754_v39 }
 0x1cf   : > { %v1377_v43 = vpop.trf.xlu0 }
 0x1d0   : > { %v1381_v44 = vunpack.i.h.bf16 %v1377_v43  ;;  %v1378_v45 = vunpack.i.l.bf16 %v1377_v43 }
 0x1d2   : > { %v757_v46 = vpack.c.bf16 %v1378_v45, %v1373_v42  ;;  %v756_v47 = vpack.c.bf16 %v1381_v44, %v1376_v41 }
 0x1d3   : > { %v1382_v48 = vpop.trf.xlu0 }
 0x1d4   : > { %844 = vmatprep.subr.bf16.mxu1 %v757_v46  ;;  %v1386_v49 = vunpack.i.h.bf16 %v1382_v48  ;;  %v1383_v50 = vunpack.i.l.bf16 %v1382_v48  ;;  %v806_v48 = vpop.permute.xlu1 %805 }
 0x1d5   : > { %845 = vmatpush1.bf16.msra.mxu1 %v756_v47 }
 0x1d7   : > { %v1387_v51 = vpop.trf.xlu0 }
 0x1d8   : > { %v1391_v52 = vunpack.i.h.bf16 %v1387_v51  ;;  %v1388_v53 = vunpack.i.l.bf16 %v1387_v51 }
 0x1da   : > { %v759_v54 = vpack.c.bf16 %v1388_v53, %v1383_v50  ;;  %v758_v55 = vpack.c.bf16 %v1391_v52, %v1386_v49 }
 0x1dc   : > { %846 = vmatprep.subr.bf16.mxu1 %v759_v54 }
 0x1dd   : > { %847 = vmatpush1.bf16.msra.mxu1 %v758_v55 }
 0x1e0   : > { %865 = vmatmul.mubr.bf16.vlgmr.msra.gmra.mrb[0].mxu1 %v1400_v56 }
 0x1e1   : > { %874 = vmatprep.mubr.bf16.mxu1 %v1470_v6 }
 0x1e8   : > { %875 = vmatmul.mubr.bf16.gmra.mrb[4].mxu1 %v1401_v57 }
 0x1e9   : > { %884 = vmatprep.mubr.bf16.mxu1 %v1470_v6 }
 0x1f0   : > { %885 = vmatmul.mubr.bf16.gmra.mrb[8].mxu1 %v1402_v58 }
 0x1f1   : > { %894 = vmatprep.mubr.bf16.mxu1 %v1470_v6 }
 0x1f8   : > { %895 = vmatmul.mubr.bf16.gmra.mrb[12].mxu1 %v1403_v59 }
 0x1f9   : > { %984 = vmatprep.mubr.bf16.mxu1 %v1470_v6 }
 0x2b3   : > { %v866_v8 = vpop.f32.mrb[0].mxu1 }
 0x2b4   : > { %v867_v9 = vadd.f32 %v866_v8, %v771_v60  ;;  %v868_v10 = vpop.f32.mrb[1].mxu1 }
 0x2b5   : > { %v869_v11 = vadd.f32 %v868_v10, %v771_v60  ;;  %v870_v63 = vpop.f32.mrb[2].mxu1  ;;  %v1404_v60 = vld [vmem:[%s1806_s5] sm:$0xff]  }
 0x2b6   : > { %v871_v12 = vadd.f32 %v870_v63, %v776_v61  ;;  %v872_v13 = vpop.f32.mrb[3].mxu1  ;;  %v905_v14 = vmax.f32 %v867_v9, 0.0 }
 0x2b7   : > { %v873_v0 = vadd.f32 %v872_v13, %v776_v61  ;;  %v906_v16 = vmax.f32 %v869_v11, 0.0  ;;  %v936_v61 = vpop.permute.xlu1 %935 }
 0x2b8   : > { %v907_v15 = vmax.f32 %v871_v12, 0.0 }
 0x2b9   : > { %v908_v17 = vmax.f32 %v873_v0, 0.0 }
 0x2ba   : > { %v923_v18 = vpack.c.bf16 %v907_v15, %v905_v14 }
 0x2bb   : > { %v924_v19 = vpack.c.bf16 %v908_v17, %v906_v16  ;;  %v876_v6 = vpop.f32.mrb[4].mxu1 }
 0x2bc   : > { %v877_v20 = vadd.f32 %v876_v6, %v781_v7  ;;  %v878_v21 = vpop.f32.mrb[5].mxu1 }
 0x2bd   : > { %v879_v22 = vadd.f32 %v878_v21, %v781_v7  ;;  %v880_v23 = vpop.f32.mrb[6].mxu1  ;;  %952 = vmatprep.subr.bf16.mxu1 %v924_v19  ;;  %v941_v7 = vpop.permute.xlu1 %940 }
 0x2be   : > { %v881_v24 = vadd.f32 %v880_v23, %v786_v62  ;;  %v882_v25 = vpop.f32.mrb[7].mxu1  ;;  %953 = vmatpush1.bf16.msra.mxu1 %v923_v18  ;;  %v909_v27 = vmax.f32 %v877_v20, 0.0 }
 0x2bf   : > { %v883_v26 = vadd.f32 %v882_v25, %v786_v62  ;;  %v910_v29 = vmax.f32 %v879_v22, 0.0  ;;  %v1037_v22 = vlaneseq }
 0x2c0   : > { %v911_v28 = vmax.f32 %v881_v24, 0.0 }
 0x2c1   : > { %v912_v30 = vmax.f32 %v883_v26, 0.0  ;;  %v1395_v0 = vpop.permute.xlu1 %1394  ;;  %vm1063_vm4 = vcmp.lt.s32.totalorder %v1037_v22, 256 }
 0x2c2   : > { %v925_v3 = vpack.c.bf16 %v911_v28, %v909_v27  ;;  %v1397_v16 = vunpack.i.h.bf16 %v1395_v0  ;;  %v1396_v17 = vunpack.i.l.bf16 %v1395_v0  ;;  %v1038_v27 = vshrl.u32 %v1037_v22, 7 }
 0x2c3   : > { %v926_v31 = vpack.c.bf16 %v912_v30, %v910_v29  ;;  %v886_v32 = vpop.f32.mrb[8].mxu1  ;;  %v1471_v30 = vmov 1966171168  }
 0x2c4   : > { %v887_v33 = vadd.f32 %v886_v32, %v791_v1  ;;  %v888_v4 = vpop.f32.mrb[9].mxu1  ;;  %v1039_v32 = vsub.s32 0, %v1038_v27 }
 0x2c5   : > { %v889_v34 = vadd.f32 %v888_v4, %v791_v1  ;;  %v890_v35 = vpop.f32.mrb[10].mxu1  ;;  %954 = vmatprep.subr.bf16.mxu1 %v926_v31  ;;  %v1035_v4 = vpop.permute.xlu1 %1034 }
 0x2c6   : > { %v891_v36 = vadd.f32 %v890_v35, %v796_v2  ;;  %v892_v37 = vpop.f32.mrb[11].mxu1  ;;  %955 = vmatpush1.bf16.msra.mxu1 %v925_v3  ;;  %v913_v39 = vmax.f32 %v887_v33, 0.0  ;;  %v1047_v3 = vunpack.c.l.s4 %v1471_v30 }
 0x2c7   : > { %v893_v5 = vadd.f32 %v892_v37, %v796_v2  ;;  %v914_v41 = vmax.f32 %v889_v34, 0.0 }
 0x2c8   : > { %v915_v40 = vmax.f32 %v891_v36, 0.0  ;;  %v1048_v36 = vunpack.c.0.s8 %v1047_v3 }
 0x2c9   : > { %v916_v42 = vmax.f32 %v893_v5, 0.0 }
 0x2ca   : > { %v927_v43 = vpack.c.bf16 %v915_v40, %v913_v39 }
 0x2cb   : > { %v928_v44 = vpack.c.bf16 %v916_v42, %v914_v41  ;;  %v896_v45 = vpop.f32.mrb[12].mxu1  ;;  %v1051_v41 = vsub.s32 %v1048_v36, %v1038_v27 }
 0x2cc   : > { %v897_v46 = vadd.f32 %v896_v45, %v801_v38  ;;  %v898_v47 = vpop.f32.mrb[13].mxu1 }
 0x2cd   : > { %v899_v49 = vadd.f32 %v898_v47, %v801_v38  ;;  %v900_v50 = vpop.f32.mrb[14].mxu1  ;;  %956 = vmatprep.subr.bf16.mxu1 %v928_v44  ;;  %v1040_v38 = vrot.slane %v1035_v4, %v1039_v32 }
 0x2ce   : > { %v901_v51 = vadd.f32 %v900_v50, %v806_v48  ;;  %v902_v52 = vpop.f32.mrb[15].mxu1  ;;  %957 = vmatpush1.bf16.msra.mxu1 %v927_v43  ;;  %v917_v54 = vmax.f32 %v897_v46, 0.0 }
 0x2cf   : > { %v903_v53 = vadd.f32 %v902_v52, %v806_v48  ;;  %v918_v56 = vmax.f32 %v899_v49, 0.0 }
 0x2d0   : > { %v919_v55 = vmax.f32 %v901_v51, 0.0 }
 0x2d1   : > { %v920_v57 = vmax.f32 %v903_v53, 0.0 }
 0x2d2   : > { %v929_v58 = vpack.c.bf16 %v919_v55, %v917_v54 }
 0x2d3   : > { %v930_v59 = vpack.c.bf16 %v920_v57, %v918_v56 }
 0x2d5   : > { %958 = vmatprep.subr.bf16.mxu1 %v930_v59 }
 0x2d6   : > { %959 = vmatpush1.bf16.msra.mxu1 %v929_v58 }
 0x2d9   : > { %1175 = vmatmul.mubr.msk.bf16.vlgmr.msra.gmra.mrb[16].mxu1 %vm948_vm3, %v1404_v60 }
 0x3ac   : > { %v986_v8 = vpop.f32.mrb[16].mxu1 }
 0x3ad   : > { %v987_v9 = vadd.f32 %v986_v8, %v936_v61  ;;  %v988_v10 = vpop.f32.mrb[17].mxu1 }
 0x3ae   : > { %v989_v62 = vadd.f32 %v988_v10, %v936_v61  ;;  %v990_v11 = vpop.f32.mrb[18].mxu1 }
 0x3af   : > { %v995_v63 = vmax.f32 %v987_v9, 0.0  ;;  %v991_v12 = vadd.f32 %v990_v11, %v941_v7  ;;  %v992_v13 = vpop.f32.mrb[19].mxu1 }
 0x3b0   : > { %v996_v14 = vmax.f32 %v989_v62, 0.0  ;;  %v993_v15 = vadd.f32 %v992_v13, %v941_v7 }
 0x3b1   : > { %v997_v18 = vmax.f32 %v991_v12, 0.0  ;;  %v1013_v19 = vmul.f32 %v1396_v17, %v995_v63 }
 0x3b2   : > { %v998_v1 = vmax.f32 %v993_v15, 0.0  ;;  %v1014_v20 = vmul.f32 %v1396_v17, %v996_v14 }
 0x3b3   : > { %v1015_v6 = vmul.f32 %v1397_v16, %v997_v18 }
 0x3b4   : > { %v1016_v21 = vmul.f32 %v1397_v16, %v998_v1 }
 0x3b5   : > { %v1017_v23 = vadd.f32 %v1015_v6, %v1013_v19 }
 0x3b6   : > { %v1024_v24 = vadd.f32 %v1016_v21, %v1014_v20 }
 0x3b7   : > { %v1018_v25 = vrot.slane %v1017_v23, 4 }
 0x3b8   : > { %v1025_v26 = vrot.slane %v1024_v24, 4 }
 0x3b9   : > { %v1019_v28 = vadd.f32 %v1018_v25, %v1017_v23 }
 0x3ba   : > { %v1026_v2 = vadd.f32 %v1025_v26, %v1024_v24 }
 0x3bb   : > { %v1020_v29 = vrot.slane %v1019_v28, 2 }
 0x3bc   : > { %v1027_v31 = vrot.slane %v1026_v2, 2 }
 0x3bd   : > { %v1021_v33 = vadd.f32 %v1020_v29, %v1019_v28 }
 0x3be   : > { %v1028_v34 = vadd.f32 %v1027_v31, %v1026_v2 }
 0x3bf   : > { %v1022_v35 = vrot.slane %v1021_v33, 1 }
 0x3c0   : > { %v1029_v37 = vrot.slane %v1028_v34, 1 }
 0x3c1   : > { %v1023_v5 = vadd.f32 %v1022_v35, %v1021_v33 }
 0x3c2   : > { %v1030_v39 = vadd.f32 %v1029_v37, %v1028_v34 }
 0x3c3   : > { %v1041_v40 = vadd.f32 %v1040_v38, %v1023_v5 }
 0x3c4   : > { %v1042_v42 = vadd.f32 %v1040_v38, %v1030_v39 }
 0x3c6   : > { %v1045_v43 = vcombine.low %v1041_v40, %v1042_v42  ;;  %1073 = sbr.rel (!%p1564_p5) target bundleno = 1000 (0x3e8), region = 60 }
 0x3c8   : > { %v1052_v44 = vrot.slane %v1045_v43, %v1051_v41 }
 0x3ca   : > { %v1059_v45 = vrot.slane %v1052_v44, %v1051_v41 }
 0x3cc   : > { %1065 = vst.msk [vmem:[%s340_s30] sm:$0x3] %vm1063_vm4, %v1059_v45 }
 0x3cd   : > { %s1818_s17 = smov (!%p1076_p11, %s1075_s17), 2 }
 0x3ce   : > { %s1752_s18 = sshll.u32 %s1818_s17, 4 }
 0x3cf   : > { %s1080_s22 = ssub.s32 32, %s1752_s18 }
 0x3d0   : > { %1081 = vsyncadd %s1747_s10, %s1080_s22  ;;  %p1179_p12 = scmp.ne.s32.totalorder %s1752_s18, 0  ;;  %s1761_s20 = scalar_lea.hbm %s1810_s9, %s1578_s24 }
 0x3d1   : > { %s1086_s26 = sshll.u32 %s340_s30, 4  ;;  %s1472_s27 = smov [#allocation3]   ;;  %s1087_s26 = int_to_ptr.vmem [resolvable:$true] %s1086_s26 }
 0x3d2   : > { %s1405_s8 = scalar_lea.vmem %s1087_s26, %s1752_s18  ;;  %s1409_s28 = sshll.u32 %s1472_s27, 4  ;;  %s1410_s28 = int_to_ptr.vmem [resolvable:$false] %s1409_s28 }
 0x3d3   : > { %p1406_p13 = scmp.ne.s32.totalorder %s1087_s26, %s1405_s8  ;;  %s1411_s29 = scalar_lea.vmem %s1410_s28, 64 }
 0x3d4   : > { %p1412_p2 = scmp.lt.s32.totalorder %s1087_s26, %s1410_s28  ;;  %p1413_p3 = scmp.lt.s32.totalorder %s1411_s29, %s1405_s8 }
 0x3d5   : > { %p1407_p0 = pnand %p1406_p13, %p1179_p12 }
 0x3d6   : > { %p1414_p4 = por %p1413_p3, %p1412_p2 }
 0x3d7   : > { %p1408_p1 = pneg %p1407_p0 }
 0x3d9   : > { %p1415_p5 = pnand %p1414_p4, %p1408_p1 }
 0x3db   : > { %1418 = shalt.err (!%p1415_p5)
}
 0x3dc   : > { %s1419_s24 = scalar_lea.hbm %s1761_s20, %s1752_s18  ;;  %s1423_s17 = scalar_lea.hbm %s1810_s9, 48 }
 0x3dd   : > { %p1420_p7 = scmp.ne.s32.totalorder %s1761_s20, %s1419_s24  ;;  %p1424_p10 = scmp.lt.u32.totalorder %s1761_s20, %s1810_s9 }
 0x3de   : > { %p1425_p11 = scmp.lt.u32.totalorder %s1423_s17, %s1419_s24  ;;  %p1427_p0 = scmp.lt.u32.totalorder %s1419_s24, %s1761_s20 }
 0x3df   : > { %p1421_p8 = pnand %p1420_p7, %p1179_p12 }
 0x3e0   : > { %p1426_p13 = por %p1425_p11, %p1424_p10 }
 0x3e1   : > { %p1422_p9 = pneg %p1421_p8 }
 0x3e2   : > { %p1428_p1 = por %p1427_p0, %p1426_p13 }
 0x3e4   : > { %p1429_p2 = pnand %p1428_p1, %p1422_p9 }
 0x3e6   : > { %1432 = shalt.err (!%p1429_p2)
}
 0x3e7   : > { %1089 = dma.vmem_to_hbm [thread:$0]  (%p1179_p12), %s1087_s26, %s1752_s18, %s1761_s20, %s1747_s10  }
 0x3e8 PF: > { %p1244_p3 = scmp.ge.s32.totalorder %s1467_s14, 2  ;;  %s1098_s25 = sand.u32 1, %s1455_s11  }
 0x3e9   : > { %s1099_s8 = scalar_lea.sflag [#allocation4], %s1098_s25 }
 0x3ea   : > { %p1241_p4 = pnand %p1244_p3, %p1568_p6 }
 0x3ec   : > { %1450 = dma.done.wait (!%p1241_p4), %s1099_s8, 32  }
 0x3ed   : > { %1452 = vsyncadd (!%p1241_p4), %s1099_s8, 4294967264  ;;  %p21_p5 = scmp.ge.s32.totalorder %s1551_s16, 4   ;;  %s1813_s11 = smov %s1459_s12 }
 0x3ee   : > { %s1814_s12 = smov %s1463_s13  ;;  %s1815_s13 = smov %s1562_s19 }
 0x3ef   : > { %s1816_s14 = smov %s1551_s16  ;;  %23 = sbr.rel (!%p21_p5) target bundleno = 6 (0x6), region = 91 }
 0x3f6   :  { %1104 = vsyncpa [#allocation4], 1 }
 0x3f7   :  { %1106 = vsyncpa [#allocation4 + $0x1], 1 }

</bundles_post_ra>
